<compile_context>
chip_gen: v7x
topology: tpu7x:2x2x1
jax: 0.10.0
libtpu: 0.0.40
codegen_flags: <defaults>
</compile_context>

<pallas_src>
import math
import functools

import jax
import jax.numpy as jnp
from jax.experimental import pallas as pl
from jax.experimental.pallas import tpu as pltpu

LN_EPS = 1e-6
NEG_INF = -1e30


# ------------------------------------------------------------------ traced in-kernel helpers

def _ln_arr(x, g, b):
    mu = jnp.mean(x, axis=-1, keepdims=True)
    var = jnp.mean(jnp.square(x - mu), axis=-1, keepdims=True)
    return (x - mu) * jax.lax.rsqrt(var + LN_EPS) * g + b


def _mha(q, k, v, m_add, wo, H, dk, dv):
    """Multi-head attention for one batch element (q/k/v already projected).

    q: [Lq, H*dk] (1/sqrt(dk) folded into the Q projection), k: [Lk, H*dk], v: [Lk, H*dv],
    m_add: additive mask broadcastable to [Lq, Lk] (0 keep / -1e30 drop), wo: [H*dv, E].
    Returns softmax(qk^T + m) v already projected by wo (per-head partial sums are
    mathematically identical to concat(heads) @ wo).
    """
    out = None
    for h in range(H):                                   # H is small & static -> unrolled
        qh = q[:, h * dk:(h + 1) * dk]
        kh = k[:, h * dk:(h + 1) * dk]
        vh = v[:, h * dv:(h + 1) * dv]
        s = jax.lax.dot_general(qh, kh, (((1,), (1,)), ((), ())),
                                preferred_element_type=jnp.float32)
        s = s + m_add                                    # masked_fill(msk==0, -inf) equivalent
        s = s - jnp.max(s, axis=-1, keepdims=True)
        p = jnp.exp(s)
        p = p * pl.reciprocal(jnp.sum(p, axis=-1, keepdims=True), approx=True)
        oh = jnp.dot(p, vh, preferred_element_type=jnp.float32)
        proj = jnp.dot(oh, wo[h * dv:(h + 1) * dv, :],
                       preferred_element_type=jnp.float32)
        out = proj if out is None else out + proj
    return out


# ------------------------------------------------------------------ Pallas kernels

def _enc_layer_kernel(x_ref, m_ref,
                      g1_ref, be1_ref, wqkv_ref, bqkv_ref, wo_ref, bo_ref,
                      g2_ref, be2_ref, w1_ref, bf1_ref, w2_ref, bf2_ref,
                      *rest, H, dk, dv, final_ln):
    if final_ln:
        gf_ref, bf_ref, o_ref = rest
    else:
        (o_ref,) = rest

    x = x_ref[0]                                         # [L, E]
    m = m_ref[0]                                         # [1 or L, L] additive

    # pre-norm self-attention (LN fused with the fused-QKV matmul, residual fused with out-proj)
    t = _ln_arr(x, g1_ref[...], be1_ref[...])
    qkv = jnp.dot(t, wqkv_ref[...], preferred_element_type=jnp.float32) + bqkv_ref[...]
    q = qkv[:, :H * dk]
    k = qkv[:, H * dk:2 * H * dk]
    v = qkv[:, 2 * H * dk:]
    x = x + _mha(q, k, v, m, wo_ref[...], H, dk, dv) + bo_ref[...]

    # pre-norm feed-forward (LN fused with FF1, residual fused with FF2)
    t = _ln_arr(x, g2_ref[...], be2_ref[...])
    hmid = jnp.maximum(jnp.dot(t, w1_ref[...], preferred_element_type=jnp.float32) + bf1_ref[...], 0.0)
    x = x + jnp.dot(hmid, w2_ref[...], preferred_element_type=jnp.float32) + bf2_ref[...]

    if final_ln:                                         # stack-final LayerNorm fused in
        x = _ln_arr(x, gf_ref[...], bf_ref[...])

    o_ref[0] = x.astype(o_ref.dtype)


def _dec_layer_kernel(x_ref, mem_ref, mt_ref, ms_ref,
                      g1_ref, be1_ref, wqkv_ref, bqkv_ref, wos_ref, bos_ref,
                      g2_ref, be2_ref, wqc_ref, bqc_ref, wkvc_ref, bkvc_ref, woc_ref, boc_ref,
                      g3_ref, be3_ref, w1_ref, bf1_ref, w2_ref, bf2_ref,
                      *rest, H, dk, dv, final_ln):
    if final_ln:
        gf_ref, bf_ref, o_ref = rest
    else:
        (o_ref,) = rest

    x = x_ref[0]                                         # [Lt, E]
    mem = mem_ref[0]                                     # [Ls, E]
    mt = mt_ref[0]                                       # self-attn additive mask
    ms = ms_ref[0]                                       # cross-attn additive mask

    # pre-norm masked self-attention
    t = _ln_arr(x, g1_ref[...], be1_ref[...])
    qkv = jnp.dot(t, wqkv_ref[...], preferred_element_type=jnp.float32) + bqkv_ref[...]
    q = qkv[:, :H * dk]
    k = qkv[:, H * dk:2 * H * dk]
    v = qkv[:, 2 * H * dk:]
    x = x + _mha(q, k, v, mt, wos_ref[...], H, dk, dv) + bos_ref[...]

    # pre-norm cross-attention (K/V from encoder memory, fused K|V matmul)
    t = _ln_arr(x, g2_ref[...], be2_ref[...])
    q = jnp.dot(t, wqc_ref[...], preferred_element_type=jnp.float32) + bqc_ref[...]
    kv = jnp.dot(mem, wkvc_ref[...], preferred_element_type=jnp.float32) + bkvc_ref[...]
    k = kv[:, :H * dk]
    v = kv[:, H * dk:]
    x = x + _mha(q, k, v, ms, woc_ref[...], H, dk, dv) + boc_ref[...]

    # pre-norm feed-forward
    t = _ln_arr(x, g3_ref[...], be3_ref[...])
    hmid = jnp.maximum(jnp.dot(t, w1_ref[...], preferred_element_type=jnp.float32) + bf1_ref[...], 0.0)
    x = x + jnp.dot(hmid, w2_ref[...], preferred_element_type=jnp.float32) + bf2_ref[...]

    if final_ln:                                         # stack-final LayerNorm fused in
        x = _ln_arr(x, gf_ref[...], bf_ref[...])

    o_ref[0] = x.astype(o_ref.dtype)


def _layernorm_kernel(x_ref, g_ref, b_ref, o_ref):
    o_ref[...] = _ln_arr(x_ref[...], g_ref[...], b_ref[...]).astype(o_ref.dtype)


def _linear_kernel(x_ref, w_ref, b_ref, o_ref):
    o_ref[...] = (jnp.dot(x_ref[...], w_ref[...], preferred_element_type=jnp.float32)
                  + b_ref[...]).astype(o_ref.dtype)


def _gen_pair_kernel(x_ref, w_ref, b_ref, o_ref):
    o_ref[0] = (jnp.dot(x_ref[0], w_ref[0], preferred_element_type=jnp.float32)
                + b_ref[0]).astype(o_ref.dtype)


# ------------------------------------------------------------------ pallas_call wrappers

def _bspec(tail_shape):
    """Per-batch 3D block: (1, *tail), indexed by the batch grid axis."""
    return pl.BlockSpec((1,) + tuple(tail_shape), lambda b: (b, 0, 0))


def _wspec(arr):
    """Full-array resident block (weights / biases / LN params)."""
    n = arr.ndim
    return pl.BlockSpec(arr.shape, lambda b, n=n: (0,) * n)


def encoder_layer(x, m_add, lp, cfg, final_norm=None):
    B, L, E = x.shape
    H, dk, dv = cfg["n_heads"], cfg["qk_dim"], cfg["v_dim"]
    att, ff = lp["att"], lp["ff"]
    args = [x, m_add,
            lp["ln1"]["g"], lp["ln1"]["b"], att["wqkv"], att["bqkv"], att["wo"], att["bo"],
            lp["ln2"]["g"], lp["ln2"]["b"], ff["w1"], ff["b1"], ff["w2"], ff["b2"]]
    if final_norm is not None:
        args += [final_norm["g"], final_norm["b"]]
    in_specs = [_bspec((L, E)), _bspec((m_add.shape[1], m_add.shape[2]))] + \
               [_wspec(a) for a in args[2:]]
    return pl.pallas_call(
        functools.partial(_enc_layer_kernel, H=H, dk=dk, dv=dv,
                          final_ln=final_norm is not None),
        out_shape=jax.ShapeDtypeStruct((B, L, E), jnp.float32),
        grid=(B,),
        in_specs=in_specs,
        out_specs=_bspec((L, E)),
        compiler_params=pltpu.CompilerParams(dimension_semantics=("parallel",)),
    )(*args)


def decoder_layer(x, mem, m_self, m_mem, lp, cfg, final_norm=None):
    B, Lt, E = x.shape
    Ls = mem.shape[1]
    H, dk, dv = cfg["n_heads"], cfg["qk_dim"], cfg["v_dim"]
    sa, ca, ff = lp["satt"], lp["catt"], lp["ff"]
    args = [x, mem, m_self, m_mem,
            lp["ln1"]["g"], lp["ln1"]["b"], sa["wqkv"], sa["bqkv"], sa["wo"], sa["bo"],
            lp["ln2"]["g"], lp["ln2"]["b"], ca["wq"], ca["bq"], ca["wkv"], ca["bkv"], ca["wo"], ca["bo"],
            lp["ln3"]["g"], lp["ln3"]["b"], ff["w1"], ff["b1"], ff["w2"], ff["b2"]]
    if final_norm is not None:
        args += [final_norm["g"], final_norm["b"]]
    in_specs = [_bspec((Lt, E)), _bspec((Ls, E)),
                _bspec((m_self.shape[1], m_self.shape[2])),
                _bspec((m_mem.shape[1], m_mem.shape[2]))] + \
               [_wspec(a) for a in args[4:]]
    return pl.pallas_call(
        functools.partial(_dec_layer_kernel, H=H, dk=dk, dv=dv,
                          final_ln=final_norm is not None),
        out_shape=jax.ShapeDtypeStruct((B, Lt, E), jnp.float32),
        grid=(B,),
        in_specs=in_specs,
        out_specs=_bspec((Lt, E)),
        compiler_params=pltpu.CompilerParams(dimension_semantics=("parallel",)),
    )(*args)


def layernorm(x, g, b):
    """Standalone LayerNorm fallback (only used if a stack has zero layers)."""
    *lead, E = x.shape
    M = int(math.prod(lead)) if lead else 1
    out = pl.pallas_call(
        _layernorm_kernel,
        out_shape=jax.ShapeDtypeStruct((M, E), jnp.float32),
    )(x.reshape(M, E), g, b)
    return out.reshape(*lead, E)


def generator(x, gp):
    """Generator linear with lane-dense (128-padded) output block; slice back to vocab size."""
    *lead, E = x.shape
    M = int(math.prod(lead)) if lead else 1
    Vp = gp["w"].shape[1]
    out = pl.pallas_call(
        _linear_kernel,
        out_shape=jax.ShapeDtypeStruct((M, Vp), jnp.float32),
    )(x.reshape(M, E), gp["w"], gp["b"])
    return out[:, :gp["v"]].reshape(*lead, gp["v"])


def generator_pair(x1, x2, gp1, gp2):
    """Both generators in one pallas_call: grid=(2,) selects stacked weights per program."""
    B, L, E = x1.shape
    M = B * L
    Vp = gp1["w"].shape[1]
    xs = jnp.stack([x1.reshape(M, E), x2.reshape(M, E)], axis=0)
    ws = jnp.stack([gp1["w"], gp2["w"]], axis=0)
    bs = jnp.stack([gp1["b"], gp2["b"]], axis=0)
    out = pl.pallas_call(
        _gen_pair_kernel,
        out_shape=jax.ShapeDtypeStruct((2, M, Vp), jnp.float32),
        grid=(2,),
        in_specs=[pl.BlockSpec((1, M, E), lambda g: (g, 0, 0)),
                  pl.BlockSpec((1, E, Vp), lambda g: (g, 0, 0)),
                  pl.BlockSpec((1, 1, Vp), lambda g: (g, 0, 0))],
        out_specs=pl.BlockSpec((1, M, Vp), lambda g: (g, 0, 0)),
        compiler_params=pltpu.CompilerParams(dimension_semantics=("parallel",)),
    )(xs, ws, bs)
    y1 = out[0, :, :gp1["v"]].reshape(B, L, gp1["v"])
    y2 = out[1, :, :gp2["v"]].reshape(B, L, gp2["v"])
    return y1, y2


# ------------------------------------------------------------------ transformer stacks

def stacked_encoder(p, x, m_add, cfg):
    layers = p["layers"]
    if not layers:
        return layernorm(x, p["norm"]["g"], p["norm"]["b"])
    for i, lp in enumerate(layers):
        fin = p["norm"] if i == len(layers) - 1 else None     # final LN fused into last layer
        x = encoder_layer(x, m_add, lp, cfg, final_norm=fin)
    return x


def stacked_decoder(p, mem, x, m_mem_add, m_self_add, cfg):
    layers = p["layers"]
    if not layers:
        return layernorm(x, p["norm"]["g"], p["norm"]["b"])
    for i, lp in enumerate(layers):
        fin = p["norm"] if i == len(layers) - 1 else None     # final LN fused into last layer
        x = decoder_layer(x, mem, m_self_add, m_mem_add, lp, cfg, final_norm=fin)
    return x


def stacked_cross_adapter(p, mem, x, m_mem_add, m_self_add, cfg):
    # TODO(synk): Stacked_CrossAdapter internals not provided; implemented as decoder-style block.
    return stacked_decoder(p, mem, x, m_mem_add, m_self_add, cfg)


# ------------------------------------------------------------------ params

def sinusoidal_pe(max_len, d):
    pos = jnp.arange(max_len, dtype=jnp.float32)[:, None]
    i2 = jnp.arange(0, d, 2, dtype=jnp.float32)[None, :]
    div = jnp.exp(-math.log(10000.0) * i2 / d)
    ang = pos * div
    pe = jnp.zeros((max_len, d), jnp.float32)
    pe = pe.at[:, 0::2].set(jnp.sin(ang))
    pe = pe.at[:, 1::2].set(jnp.cos(ang))
    return pe


def init_params(key, cfg):
    E, H, dk, dv, F = cfg["emb_dim"], cfg["n_heads"], cfg["qk_dim"], cfg["v_dim"], cfg["ff_dim"]
    scale = 1.0 / math.sqrt(dk)
    keys = iter(jax.random.split(key, 4096))

    def w(din, dout):
        return jax.random.normal(next(keys), (din, dout), jnp.float32) * 0.02

    def zrow(n):
        return jnp.zeros((1, n), jnp.float32)

    def ln():
        return {"g": jnp.ones((1, E), jnp.float32), "b": jnp.zeros((1, E), jnp.float32)}

    def self_attn_p():
        # fused Q|K|V weight; 1/sqrt(dk) folded into the Q columns (weights + bias).
        wq, wk, wv = w(E, H * dk), w(E, H * dk), w(E, H * dv)
        return {"wqkv": jnp.concatenate([wq * scale, wk, wv], axis=1),
                "bqkv": zrow(2 * H * dk + H * dv),
                "wo": w(H * dv, E), "bo": zrow(E)}

    def cross_attn_p():
        return {"wq": w(E, H * dk) * scale, "bq": zrow(H * dk),
                "wkv": jnp.concatenate([w(E, H * dk), w(E, H * dv)], axis=1),
                "bkv": zrow(H * dk + H * dv),
                "wo": w(H * dv, E), "bo": zrow(E)}

    def ff_p():
        return {"w1": w(E, F), "b1": zrow(F), "w2": w(F, E), "b2": zrow(E)}

    def enc_layer():
        return {"ln1": ln(), "att": self_attn_p(), "ln2": ln(), "ff": ff_p()}

    def dec_layer():
        return {"ln1": ln(), "satt": self_attn_p(),
                "ln2": ln(), "catt": cross_attn_p(),
                "ln3": ln(), "ff": ff_p()}

    def gen_p():
        V = cfg["tgt_voc_size"]
        Vp = ((V + 127) // 128) * 128          # lane-dense output block (pad then slice back)
        wp = jnp.zeros((E, Vp), jnp.float32).at[:, :V].set(w(E, V))
        return {"w": wp, "b": jnp.zeros((1, Vp), jnp.float32), "v": V}

    src_emb = jax.random.normal(next(keys), (cfg["src_voc_size"], E), jnp.float32) * 0.02
    tgt_emb = jax.random.normal(next(keys), (cfg["tgt_voc_size"], E), jnp.float32) * 0.02
    src_emb = src_emb.at[cfg["idx_pad"]].set(0.0)      # nn.Embedding padding_idx row
    tgt_emb = tgt_emb.at[cfg["idx_pad"]].set(0.0)

    return {
        "src_emb": src_emb,
        "tgt_emb": tgt_emb,
        "pe": sinusoidal_pe(5000, E),
        "encoder": {"layers": [enc_layer() for _ in range(cfg["n_layers"])], "norm": ln()},
        "decoder": {"layers": [dec_layer() for _ in range(cfg["n_layers"])], "norm": ln()},
        "cross_xtgt": {"layers": [dec_layer()], "norm": ln()},
        "cross_tgt": {"layers": [dec_layer()], "norm": ln()},
        "gen_hide": gen_p(),
        "gen_trns": gen_p(),
    }


# ------------------------------------------------------------------ model forward

def additive_mask(msk):
    """{0,1} mask -> additive mask (0 keep / -1e30 drop); never broadcast per head."""
    return jnp.where(msk > 0.5, 0.0, NEG_INF).astype(jnp.float32)


def _expand_self_mask(m, Lq):
    """Broadcast a pad-only [B,1,Lk] additive mask to [B,Lq,Lk] (only used for pass batching)."""
    if m.shape[1] == Lq:
        return m
    return jnp.broadcast_to(m, (m.shape[0], Lq, m.shape[2]))


def forward(params, src, xsrc, xtgt, tgt,
            msk_src, msk_xsrc, msk_xtgt, msk_tgt, msk_tgt_cross, cfg):
    E = cfg["emb_dim"]

    def embed(tok, table):
        return table[tok] * math.sqrt(E)

    def add_pe(x):                       # dropout == identity (inference)
        return x + params["pe"][: x.shape[1]][None]

    a_src = additive_mask(msk_src)
    a_xsrc = additive_mask(msk_xsrc)
    a_xtgt = additive_mask(msk_xtgt)
    a_tgt = additive_mask(msk_tgt)
    a_tgt_c = additive_mask(msk_tgt_cross)

    xsrc_e = add_pe(embed(xsrc, params["src_emb"]))
    src_e = add_pe(embed(src, params["src_emb"]))
    xtgt_e = add_pe(embed(xtgt, params["tgt_emb"]))
    tgt_e = add_pe(embed(tgt, params["tgt_emb"]))

    # --- the two (independent) encoder passes, batched along batch when shapes allow
    if xsrc_e.shape == src_e.shape and a_xsrc.shape == a_src.shape:
        z_both = stacked_encoder(params["encoder"],
                                 jnp.concatenate([xsrc_e, src_e], axis=0),
                                 jnp.concatenate([a_xsrc, a_src], axis=0), cfg)
        z_xsrc, z_src = jnp.split(z_both, 2, axis=0)
    else:
        z_xsrc = stacked_encoder(params["encoder"], xsrc_e, a_xsrc, cfg)
        z_src = stacked_encoder(params["encoder"], src_e, a_src, cfg)

    # --- the two (independent) decoder passes, batched along batch when shapes allow
    if (xtgt_e.shape == tgt_e.shape and z_xsrc.shape == z_src.shape
            and a_xsrc.shape == a_src.shape):
        Lq = xtgt_e.shape[1]
        m_self = jnp.concatenate([_expand_self_mask(a_xtgt, Lq),
                                  _expand_self_mask(a_tgt, Lq)], axis=0)
        m_mem = jnp.concatenate([a_xsrc, a_src], axis=0)
        z_both = stacked_decoder(params["decoder"],
                                 jnp.concatenate([z_xsrc, z_src], axis=0),
                                 jnp.concatenate([xtgt_e, tgt_e], axis=0),
                                 m_mem, m_self, cfg)
        z_xtgt, z_tgt = jnp.split(z_both, 2, axis=0)
    else:
        z_xtgt = stacked_decoder(params["decoder"], z_xsrc, xtgt_e, a_xsrc, a_xtgt, cfg)
        z_tgt = stacked_decoder(params["decoder"], z_src, tgt_e, a_src, a_tgt, cfg)

    # --- cross adapters (sequentially dependent, cannot batch)
    z_xtgt = stacked_cross_adapter(params["cross_xtgt"], z_src, z_xtgt, a_src, a_xtgt, cfg)
    z_tgt = stacked_cross_adapter(params["cross_tgt"], z_xtgt, z_tgt, a_xtgt, a_tgt_c, cfg)

    # --- generators (raw logits, as in reference forward()); one batched call when shapes allow
    if z_xtgt.shape == z_tgt.shape and params["gen_hide"]["w"].shape == params["gen_trns"]["w"].shape:
        y_hide, y_trns = generator_pair(z_xtgt, z_tgt, params["gen_hide"], params["gen_trns"])
    else:
        y_hide = generator(z_xtgt, params["gen_hide"])
        y_trns = generator(z_tgt, params["gen_trns"])
    return y_hide, y_trns


# ------------------------------------------------------------------ main

if __name__ == "__main__":
    cfg = dict(n_layers=2, ff_dim=64, n_heads=4, emb_dim=32, qk_dim=8, v_dim=8,
               dropout=0.0, share_embeddings=False,
               src_voc_size=50, tgt_voc_size=60, idx_pad=0)
    B, Ls, Lxs, Lxt, Lt = 2, 8, 8, 8, 8

    key = jax.random.PRNGKey(0)
    kp, kd = jax.random.split(key)
    params = init_params(kp, cfg)

    k1, k2, k3, k4 = jax.random.split(kd, 4)
    src = jax.random.randint(k1, (B, Ls), 1, cfg["src_voc_size"], dtype=jnp.int32)
    xsrc = jax.random.randint(k2, (B, Lxs), 1, cfg["src_voc_size"], dtype=jnp.int32)
    xtgt = jax.random.randint(k3, (B, Lxt), 1, cfg["tgt_voc_size"], dtype=jnp.int32)
    tgt = jax.random.randint(k4, (B, Lt), 1, cfg["tgt_voc_size"], dtype=jnp.int32)
    # introduce some padding tokens
    src = src.at[:, -1].set(cfg["idx_pad"])
    xsrc = xsrc.at[:, -1].set(cfg["idx_pad"])

    def pad_mask(tok):        # [B, 1, L]
        return (tok != cfg["idx_pad"])[:, None, :].astype(jnp.float32)

    def causal_mask(tok):     # [B, L, L]  (pad & subsequent)
        L = tok.shape[1]
        pad = (tok != cfg["idx_pad"])[:, None, :]
        caus = jnp.tril(jnp.ones((L, L), dtype=bool))[None]
        return (pad & caus).astype(jnp.float32)

    msk_src = pad_mask(src)
    msk_xsrc = pad_mask(xsrc)
    msk_xtgt = pad_mask(xtgt)          # xtgt is fully visible (hide task)
    msk_tgt = causal_mask(tgt)
    msk_tgt_cross = pad_mask(tgt)

    y_hide, y_trns = forward(params, src, xsrc, xtgt, tgt,
                             msk_src, msk_xsrc, msk_xtgt, msk_tgt, msk_tgt_cross, cfg)
    jax.block_until_ready((y_hide, y_trns))

    assert y_hide.shape == (B, Lxt, cfg["tgt_voc_size"])
    assert y_trns.shape == (B, Lt, cfg["tgt_voc_size"])
    assert jnp.all(jnp.isfinite(y_hide)) and jnp.all(jnp.isfinite(y_trns))
    print("KERNEL_OK")
</pallas_src>

<mosaic_0001>
module attributes {stable_mosaic.version = 11 : i64} {
  func.func @_enc_layer_kernel(%arg0: i32, %arg1: memref<1x8x32xf32, #tpu.memory_space<vmem>>, %arg2: memref<1x1x8xf32, #tpu.memory_space<vmem>>, %arg3: memref<1x32xf32, #tpu.memory_space<vmem>>, %arg4: memref<1x32xf32, #tpu.memory_space<vmem>>, %arg5: memref<32x96xf32, #tpu.memory_space<vmem>>, %arg6: memref<1x96xf32, #tpu.memory_space<vmem>>, %arg7: memref<32x32xf32, #tpu.memory_space<vmem>>, %arg8: memref<1x32xf32, #tpu.memory_space<vmem>>, %arg9: memref<1x32xf32, #tpu.memory_space<vmem>>, %arg10: memref<1x32xf32, #tpu.memory_space<vmem>>, %arg11: memref<32x64xf32, #tpu.memory_space<vmem>>, %arg12: memref<1x64xf32, #tpu.memory_space<vmem>>, %arg13: memref<64x32xf32, #tpu.memory_space<vmem>>, %arg14: memref<1x32xf32, #tpu.memory_space<vmem>>, %arg15: memref<1x8x32xf32, #tpu.memory_space<vmem>>) attributes {dimension_semantics = [#tpu.dimension_semantics<parallel>], iteration_bounds = array<i64: 4>, scalar_prefetch = 0 : i64, scratch_operands = 0 : i64, tpu.core_type = #tpu.core_type<tc>, window_params = [{transform_indices = @transform_0, window_bounds = array<i64: 1, 8, 32>}, {transform_indices = @transform_1, window_bounds = array<i64: 1, 1, 8>}, {pipeline_mode = #tpu.pipeline_mode<synchronous>, transform_indices = @transform_2, window_bounds = array<i64: 1, 32>}, {pipeline_mode = #tpu.pipeline_mode<synchronous>, transform_indices = @transform_3, window_bounds = array<i64: 1, 32>}, {pipeline_mode = #tpu.pipeline_mode<synchronous>, transform_indices = @transform_4, window_bounds = array<i64: 32, 96>}, {pipeline_mode = #tpu.pipeline_mode<synchronous>, transform_indices = @transform_5, window_bounds = array<i64: 1, 96>}, {pipeline_mode = #tpu.pipeline_mode<synchronous>, transform_indices = @transform_6, window_bounds = array<i64: 32, 32>}, {pipeline_mode = #tpu.pipeline_mode<synchronous>, transform_indices = @transform_7, window_bounds = array<i64: 1, 32>}, {pipeline_mode = #tpu.pipeline_mode<synchronous>, transform_indices = @transform_8, window_bounds = array<i64: 1, 32>}, {pipeline_mode = #tpu.pipeline_mode<synchronous>, transform_indices = @transform_9, window_bounds = array<i64: 1, 32>}, {pipeline_mode = #tpu.pipeline_mode<synchronous>, transform_indices = @transform_10, window_bounds = array<i64: 32, 64>}, {pipeline_mode = #tpu.pipeline_mode<synchronous>, transform_indices = @transform_11, window_bounds = array<i64: 1, 64>}, {pipeline_mode = #tpu.pipeline_mode<synchronous>, transform_indices = @transform_12, window_bounds = array<i64: 64, 32>}, {pipeline_mode = #tpu.pipeline_mode<synchronous>, transform_indices = @transform_13, window_bounds = array<i64: 1, 32>}, {transform_indices = @transform_14, window_bounds = array<i64: 1, 8, 32>}]} {
    %c0 = arith.constant 0 : index
    %c0_0 = arith.constant 0 : index
    %c0_1 = arith.constant 0 : index
    %0 = vector.load %arg1[%c0, %c0_0, %c0_1] : memref<1x8x32xf32, #tpu.memory_space<vmem>>, vector<1x8x32xf32>
    %1 = vector.shape_cast %0 : vector<1x8x32xf32> to vector<8x32xf32>
    %c0_2 = arith.constant 0 : index
    %c0_3 = arith.constant 0 : index
    %c0_4 = arith.constant 0 : index
    %2 = vector.load %arg2[%c0_2, %c0_3, %c0_4] : memref<1x1x8xf32, #tpu.memory_space<vmem>>, vector<1x1x8xf32>
    %3 = vector.shape_cast %2 : vector<1x1x8xf32> to vector<1x8xf32>
    %c0_5 = arith.constant 0 : index
    %c0_6 = arith.constant 0 : index
    %4 = vector.load %arg3[%c0_5, %c0_6] : memref<1x32xf32, #tpu.memory_space<vmem>>, vector<1x32xf32>
    %c0_7 = arith.constant 0 : index
    %c0_8 = arith.constant 0 : index
    %5 = vector.load %arg4[%c0_7, %c0_8] : memref<1x32xf32, #tpu.memory_space<vmem>>, vector<1x32xf32>
    %cst = arith.constant dense<0.000000e+00> : vector<8xf32>
    %6 = vector.multi_reduction <add>, %1, %cst [1] : vector<8x32xf32> to vector<8xf32>
    %7 = vector.shape_cast %6 : vector<8xf32> to vector<8x1xf32>
    %cst_9 = arith.constant 3.200000e+01 : f32
    %8 = vector.broadcast %cst_9 : f32 to vector<8x1xf32>
    %9 = arith.divf %7, %8 : vector<8x1xf32>
    %10 = vector.broadcast %9 : vector<8x1xf32> to vector<8x32xf32>
    %11 = arith.subf %1, %10 : vector<8x32xf32>
    %12 = arith.mulf %11, %11 : vector<8x32xf32>
    %cst_10 = arith.constant dense<0.000000e+00> : vector<8xf32>
    %13 = vector.multi_reduction <add>, %12, %cst_10 [1] : vector<8x32xf32> to vector<8xf32>
    %14 = vector.shape_cast %13 : vector<8xf32> to vector<8x1xf32>
    %cst_11 = arith.constant 3.200000e+01 : f32
    %15 = vector.broadcast %cst_11 : f32 to vector<8x1xf32>
    %16 = arith.divf %14, %15 : vector<8x1xf32>
    %17 = vector.broadcast %9 : vector<8x1xf32> to vector<8x32xf32>
    %18 = arith.subf %1, %17 : vector<8x32xf32>
    %cst_12 = arith.constant 9.99999997E-7 : f32
    %19 = vector.broadcast %cst_12 : f32 to vector<8x1xf32>
    %20 = arith.addf %16, %19 : vector<8x1xf32>
    %21 = math.rsqrt %20 : vector<8x1xf32>
    %22 = vector.broadcast %21 : vector<8x1xf32> to vector<8x32xf32>
    %23 = arith.mulf %18, %22 : vector<8x32xf32>
    %24 = vector.broadcast %4 : vector<1x32xf32> to vector<8x32xf32>
    %25 = arith.mulf %23, %24 : vector<8x32xf32>
    %26 = vector.broadcast %5 : vector<1x32xf32> to vector<8x32xf32>
    %27 = arith.addf %25, %26 : vector<8x32xf32>
    %c0_13 = arith.constant 0 : index
    %c0_14 = arith.constant 0 : index
    %28 = vector.load %arg5[%c0_13, %c0_14] : memref<32x96xf32, #tpu.memory_space<vmem>>, vector<32x96xf32>
    %cst_15 = arith.constant dense<0.000000e+00> : vector<8x96xf32>
    %29 = tpu.matmul %27, %28, %cst_15 {dimension_numbers = #tpu.dot_dimension_numbers<[1], [0], [0], [1], [0, 0, 1, 1], [], []>} : vector<8x32xf32>, vector<32x96xf32>, vector<8x96xf32> -> vector<8x96xf32>
    %c0_16 = arith.constant 0 : index
    %c0_17 = arith.constant 0 : index
    %30 = vector.load %arg6[%c0_16, %c0_17] : memref<1x96xf32, #tpu.memory_space<vmem>>, vector<1x96xf32>
    %31 = vector.broadcast %30 : vector<1x96xf32> to vector<8x96xf32>
    %32 = arith.addf %29, %31 : vector<8x96xf32>
    %33 = vector.extract_strided_slice %32 {offsets = [0, 0], sizes = [8, 32], strides = [1, 1]} : vector<8x96xf32> to vector<8x32xf32>
    %34 = vector.extract_strided_slice %32 {offsets = [0, 32], sizes = [8, 32], strides = [1, 1]} : vector<8x96xf32> to vector<8x32xf32>
    %35 = vector.extract_strided_slice %32 {offsets = [0, 64], sizes = [8, 32], strides = [1, 1]} : vector<8x96xf32> to vector<8x32xf32>
    %c0_18 = arith.constant 0 : index
    %c0_19 = arith.constant 0 : index
    %36 = vector.load %arg7[%c0_18, %c0_19] : memref<32x32xf32, #tpu.memory_space<vmem>>, vector<32x32xf32>
    %37 = vector.extract_strided_slice %33 {offsets = [0, 0], sizes = [8, 8], strides = [1, 1]} : vector<8x32xf32> to vector<8x8xf32>
    %38 = vector.extract_strided_slice %34 {offsets = [0, 0], sizes = [8, 8], strides = [1, 1]} : vector<8x32xf32> to vector<8x8xf32>
    %39 = vector.extract_strided_slice %35 {offsets = [0, 0], sizes = [8, 8], strides = [1, 1]} : vector<8x32xf32> to vector<8x8xf32>
    %cst_20 = arith.constant dense<0.000000e+00> : vector<8x8xf32>
    %40 = tpu.matmul %37, %38, %cst_20 {dimension_numbers = #tpu.dot_dimension_numbers<[1], [1], [0], [0], [0, 0, 1, 0], [], []>} : vector<8x8xf32>, vector<8x8xf32>, vector<8x8xf32> -> vector<8x8xf32>
    %41 = vector.broadcast %3 : vector<1x8xf32> to vector<8x8xf32>
    %42 = arith.addf %40, %41 : vector<8x8xf32>
    %cst_21 = arith.constant dense<0xFF800000> : vector<8xf32>
    %43 = vector.multi_reduction <maximumf>, %42, %cst_21 [1] : vector<8x8xf32> to vector<8xf32>
    %44 = vector.shape_cast %43 : vector<8xf32> to vector<8x1xf32>
    %45 = vector.broadcast %44 : vector<8x1xf32> to vector<8x8xf32>
    %46 = arith.subf %42, %45 : vector<8x8xf32>
    %47 = math.exp %46 : vector<8x8xf32>
    %cst_22 = arith.constant dense<0.000000e+00> : vector<8xf32>
    %48 = vector.multi_reduction <add>, %47, %cst_22 [1] : vector<8x8xf32> to vector<8xf32>
    %49 = vector.shape_cast %48 : vector<8xf32> to vector<8x1xf32>
    %50 = tpu.reciprocal %49 {approx = true} : vector<8x1xf32> -> vector<8x1xf32>
    %51 = vector.broadcast %50 : vector<8x1xf32> to vector<8x8xf32>
    %52 = arith.mulf %47, %51 : vector<8x8xf32>
    %cst_23 = arith.constant dense<0.000000e+00> : vector<8x8xf32>
    %53 = tpu.matmul %52, %39, %cst_23 {dimension_numbers = #tpu.dot_dimension_numbers<[1], [0], [0], [1], [0, 0, 1, 1], [], []>} : vector<8x8xf32>, vector<8x8xf32>, vector<8x8xf32> -> vector<8x8xf32>
    %54 = vector.extract_strided_slice %36 {offsets = [0, 0], sizes = [8, 32], strides = [1, 1]} : vector<32x32xf32> to vector<8x32xf32>
    %cst_24 = arith.constant dense<0.000000e+00> : vector<8x32xf32>
    %55 = tpu.matmul %53, %54, %cst_24 {dimension_numbers = #tpu.dot_dimension_numbers<[1], [0], [0], [1], [0, 0, 1, 1], [], []>} : vector<8x8xf32>, vector<8x32xf32>, vector<8x32xf32> -> vector<8x32xf32>
    %56 = vector.extract_strided_slice %33 {offsets = [0, 8], sizes = [8, 8], strides = [1, 1]} : vector<8x32xf32> to vector<8x8xf32>
    %57 = vector.extract_strided_slice %34 {offsets = [0, 8], sizes = [8, 8], strides = [1, 1]} : vector<8x32xf32> to vector<8x8xf32>
    %58 = vector.extract_strided_slice %35 {offsets = [0, 8], sizes = [8, 8], strides = [1, 1]} : vector<8x32xf32> to vector<8x8xf32>
    %cst_25 = arith.constant dense<0.000000e+00> : vector<8x8xf32>
    %59 = tpu.matmul %56, %57, %cst_25 {dimension_numbers = #tpu.dot_dimension_numbers<[1], [1], [0], [0], [0, 0, 1, 0], [], []>} : vector<8x8xf32>, vector<8x8xf32>, vector<8x8xf32> -> vector<8x8xf32>
    %60 = vector.broadcast %3 : vector<1x8xf32> to vector<8x8xf32>
    %61 = arith.addf %59, %60 : vector<8x8xf32>
    %cst_26 = arith.constant dense<0xFF800000> : vector<8xf32>
    %62 = vector.multi_reduction <maximumf>, %61, %cst_26 [1] : vector<8x8xf32> to vector<8xf32>
    %63 = vector.shape_cast %62 : vector<8xf32> to vector<8x1xf32>
    %64 = vector.broadcast %63 : vector<8x1xf32> to vector<8x8xf32>
    %65 = arith.subf %61, %64 : vector<8x8xf32>
    %66 = math.exp %65 : vector<8x8xf32>
    %cst_27 = arith.constant dense<0.000000e+00> : vector<8xf32>
    %67 = vector.multi_reduction <add>, %66, %cst_27 [1] : vector<8x8xf32> to vector<8xf32>
    %68 = vector.shape_cast %67 : vector<8xf32> to vector<8x1xf32>
    %69 = tpu.reciprocal %68 {approx = true} : vector<8x1xf32> -> vector<8x1xf32>
    %70 = vector.broadcast %69 : vector<8x1xf32> to vector<8x8xf32>
    %71 = arith.mulf %66, %70 : vector<8x8xf32>
    %cst_28 = arith.constant dense<0.000000e+00> : vector<8x8xf32>
    %72 = tpu.matmul %71, %58, %cst_28 {dimension_numbers = #tpu.dot_dimension_numbers<[1], [0], [0], [1], [0, 0, 1, 1], [], []>} : vector<8x8xf32>, vector<8x8xf32>, vector<8x8xf32> -> vector<8x8xf32>
    %73 = vector.extract_strided_slice %36 {offsets = [8, 0], sizes = [8, 32], strides = [1, 1]} : vector<32x32xf32> to vector<8x32xf32>
    %cst_29 = arith.constant dense<0.000000e+00> : vector<8x32xf32>
    %74 = tpu.matmul %72, %73, %cst_29 {dimension_numbers = #tpu.dot_dimension_numbers<[1], [0], [0], [1], [0, 0, 1, 1], [], []>} : vector<8x8xf32>, vector<8x32xf32>, vector<8x32xf32> -> vector<8x32xf32>
    %75 = arith.addf %55, %74 : vector<8x32xf32>
    %76 = vector.extract_strided_slice %33 {offsets = [0, 16], sizes = [8, 8], strides = [1, 1]} : vector<8x32xf32> to vector<8x8xf32>
    %77 = vector.extract_strided_slice %34 {offsets = [0, 16], sizes = [8, 8], strides = [1, 1]} : vector<8x32xf32> to vector<8x8xf32>
    %78 = vector.extract_strided_slice %35 {offsets = [0, 16], sizes = [8, 8], strides = [1, 1]} : vector<8x32xf32> to vector<8x8xf32>
    %cst_30 = arith.constant dense<0.000000e+00> : vector<8x8xf32>
    %79 = tpu.matmul %76, %77, %cst_30 {dimension_numbers = #tpu.dot_dimension_numbers<[1], [1], [0], [0], [0, 0, 1, 0], [], []>} : vector<8x8xf32>, vector<8x8xf32>, vector<8x8xf32> -> vector<8x8xf32>
    %80 = vector.broadcast %3 : vector<1x8xf32> to vector<8x8xf32>
    %81 = arith.addf %79, %80 : vector<8x8xf32>
    %cst_31 = arith.constant dense<0xFF800000> : vector<8xf32>
    %82 = vector.multi_reduction <maximumf>, %81, %cst_31 [1] : vector<8x8xf32> to vector<8xf32>
    %83 = vector.shape_cast %82 : vector<8xf32> to vector<8x1xf32>
    %84 = vector.broadcast %83 : vector<8x1xf32> to vector<8x8xf32>
    %85 = arith.subf %81, %84 : vector<8x8xf32>
    %86 = math.exp %85 : vector<8x8xf32>
    %cst_32 = arith.constant dense<0.000000e+00> : vector<8xf32>
    %87 = vector.multi_reduction <add>, %86, %cst_32 [1] : vector<8x8xf32> to vector<8xf32>
    %88 = vector.shape_cast %87 : vector<8xf32> to vector<8x1xf32>
    %89 = tpu.reciprocal %88 {approx = true} : vector<8x1xf32> -> vector<8x1xf32>
    %90 = vector.broadcast %89 : vector<8x1xf32> to vector<8x8xf32>
    %91 = arith.mulf %86, %90 : vector<8x8xf32>
    %cst_33 = arith.constant dense<0.000000e+00> : vector<8x8xf32>
    %92 = tpu.matmul %91, %78, %cst_33 {dimension_numbers = #tpu.dot_dimension_numbers<[1], [0], [0], [1], [0, 0, 1, 1], [], []>} : vector<8x8xf32>, vector<8x8xf32>, vector<8x8xf32> -> vector<8x8xf32>
    %93 = vector.extract_strided_slice %36 {offsets = [16, 0], sizes = [8, 32], strides = [1, 1]} : vector<32x32xf32> to vector<8x32xf32>
    %cst_34 = arith.constant dense<0.000000e+00> : vector<8x32xf32>
    %94 = tpu.matmul %92, %93, %cst_34 {dimension_numbers = #tpu.dot_dimension_numbers<[1], [0], [0], [1], [0, 0, 1, 1], [], []>} : vector<8x8xf32>, vector<8x32xf32>, vector<8x32xf32> -> vector<8x32xf32>
    %95 = arith.addf %75, %94 : vector<8x32xf32>
    %96 = vector.extract_strided_slice %33 {offsets = [0, 24], sizes = [8, 8], strides = [1, 1]} : vector<8x32xf32> to vector<8x8xf32>
    %97 = vector.extract_strided_slice %34 {offsets = [0, 24], sizes = [8, 8], strides = [1, 1]} : vector<8x32xf32> to vector<8x8xf32>
    %98 = vector.extract_strided_slice %35 {offsets = [0, 24], sizes = [8, 8], strides = [1, 1]} : vector<8x32xf32> to vector<8x8xf32>
    %cst_35 = arith.constant dense<0.000000e+00> : vector<8x8xf32>
    %99 = tpu.matmul %96, %97, %cst_35 {dimension_numbers = #tpu.dot_dimension_numbers<[1], [1], [0], [0], [0, 0, 1, 0], [], []>} : vector<8x8xf32>, vector<8x8xf32>, vector<8x8xf32> -> vector<8x8xf32>
    %100 = vector.broadcast %3 : vector<1x8xf32> to vector<8x8xf32>
    %101 = arith.addf %99, %100 : vector<8x8xf32>
    %cst_36 = arith.constant dense<0xFF800000> : vector<8xf32>
    %102 = vector.multi_reduction <maximumf>, %101, %cst_36 [1] : vector<8x8xf32> to vector<8xf32>
    %103 = vector.shape_cast %102 : vector<8xf32> to vector<8x1xf32>
    %104 = vector.broadcast %103 : vector<8x1xf32> to vector<8x8xf32>
    %105 = arith.subf %101, %104 : vector<8x8xf32>
    %106 = math.exp %105 : vector<8x8xf32>
    %cst_37 = arith.constant dense<0.000000e+00> : vector<8xf32>
    %107 = vector.multi_reduction <add>, %106, %cst_37 [1] : vector<8x8xf32> to vector<8xf32>
    %108 = vector.shape_cast %107 : vector<8xf32> to vector<8x1xf32>
    %109 = tpu.reciprocal %108 {approx = true} : vector<8x1xf32> -> vector<8x1xf32>
    %110 = vector.broadcast %109 : vector<8x1xf32> to vector<8x8xf32>
    %111 = arith.mulf %106, %110 : vector<8x8xf32>
    %cst_38 = arith.constant dense<0.000000e+00> : vector<8x8xf32>
    %112 = tpu.matmul %111, %98, %cst_38 {dimension_numbers = #tpu.dot_dimension_numbers<[1], [0], [0], [1], [0, 0, 1, 1], [], []>} : vector<8x8xf32>, vector<8x8xf32>, vector<8x8xf32> -> vector<8x8xf32>
    %113 = vector.extract_strided_slice %36 {offsets = [24, 0], sizes = [8, 32], strides = [1, 1]} : vector<32x32xf32> to vector<8x32xf32>
    %cst_39 = arith.constant dense<0.000000e+00> : vector<8x32xf32>
    %114 = tpu.matmul %112, %113, %cst_39 {dimension_numbers = #tpu.dot_dimension_numbers<[1], [0], [0], [1], [0, 0, 1, 1], [], []>} : vector<8x8xf32>, vector<8x32xf32>, vector<8x32xf32> -> vector<8x32xf32>
    %115 = arith.addf %95, %114 : vector<8x32xf32>
    %116 = arith.addf %1, %115 : vector<8x32xf32>
    %c0_40 = arith.constant 0 : index
    %c0_41 = arith.constant 0 : index
    %117 = vector.load %arg8[%c0_40, %c0_41] : memref<1x32xf32, #tpu.memory_space<vmem>>, vector<1x32xf32>
    %118 = vector.broadcast %117 : vector<1x32xf32> to vector<8x32xf32>
    %119 = arith.addf %116, %118 : vector<8x32xf32>
    %c0_42 = arith.constant 0 : index
    %c0_43 = arith.constant 0 : index
    %120 = vector.load %arg9[%c0_42, %c0_43] : memref<1x32xf32, #tpu.memory_space<vmem>>, vector<1x32xf32>
    %c0_44 = arith.constant 0 : index
    %c0_45 = arith.constant 0 : index
    %121 = vector.load %arg10[%c0_44, %c0_45] : memref<1x32xf32, #tpu.memory_space<vmem>>, vector<1x32xf32>
    %cst_46 = arith.constant dense<0.000000e+00> : vector<8xf32>
    %122 = vector.multi_reduction <add>, %119, %cst_46 [1] : vector<8x32xf32> to vector<8xf32>
    %123 = vector.shape_cast %122 : vector<8xf32> to vector<8x1xf32>
    %cst_47 = arith.constant 3.200000e+01 : f32
    %124 = vector.broadcast %cst_47 : f32 to vector<8x1xf32>
    %125 = arith.divf %123, %124 : vector<8x1xf32>
    %126 = vector.broadcast %125 : vector<8x1xf32> to vector<8x32xf32>
    %127 = arith.subf %119, %126 : vector<8x32xf32>
    %128 = arith.mulf %127, %127 : vector<8x32xf32>
    %cst_48 = arith.constant dense<0.000000e+00> : vector<8xf32>
    %129 = vector.multi_reduction <add>, %128, %cst_48 [1] : vector<8x32xf32> to vector<8xf32>
    %130 = vector.shape_cast %129 : vector<8xf32> to vector<8x1xf32>
    %cst_49 = arith.constant 3.200000e+01 : f32
    %131 = vector.broadcast %cst_49 : f32 to vector<8x1xf32>
    %132 = arith.divf %130, %131 : vector<8x1xf32>
    %133 = vector.broadcast %125 : vector<8x1xf32> to vector<8x32xf32>
    %134 = arith.subf %119, %133 : vector<8x32xf32>
    %cst_50 = arith.constant 9.99999997E-7 : f32
    %135 = vector.broadcast %cst_50 : f32 to vector<8x1xf32>
    %136 = arith.addf %132, %135 : vector<8x1xf32>
    %137 = math.rsqrt %136 : vector<8x1xf32>
    %138 = vector.broadcast %137 : vector<8x1xf32> to vector<8x32xf32>
    %139 = arith.mulf %134, %138 : vector<8x32xf32>
    %140 = vector.broadcast %120 : vector<1x32xf32> to vector<8x32xf32>
    %141 = arith.mulf %139, %140 : vector<8x32xf32>
    %142 = vector.broadcast %121 : vector<1x32xf32> to vector<8x32xf32>
    %143 = arith.addf %141, %142 : vector<8x32xf32>
    %c0_51 = arith.constant 0 : index
    %c0_52 = arith.constant 0 : index
    %144 = vector.load %arg11[%c0_51, %c0_52] : memref<32x64xf32, #tpu.memory_space<vmem>>, vector<32x64xf32>
    %cst_53 = arith.constant dense<0.000000e+00> : vector<8x64xf32>
    %145 = tpu.matmul %143, %144, %cst_53 {dimension_numbers = #tpu.dot_dimension_numbers<[1], [0], [0], [1], [0, 0, 1, 1], [], []>} : vector<8x32xf32>, vector<32x64xf32>, vector<8x64xf32> -> vector<8x64xf32>
    %c0_54 = arith.constant 0 : index
    %c0_55 = arith.constant 0 : index
    %146 = vector.load %arg12[%c0_54, %c0_55] : memref<1x64xf32, #tpu.memory_space<vmem>>, vector<1x64xf32>
    %147 = vector.broadcast %146 : vector<1x64xf32> to vector<8x64xf32>
    %148 = arith.addf %145, %147 : vector<8x64xf32>
    %cst_56 = arith.constant 0.000000e+00 : f32
    %149 = vector.broadcast %cst_56 : f32 to vector<8x64xf32>
    %150 = arith.maximumf %148, %149 : vector<8x64xf32>
    %c0_57 = arith.constant 0 : index
    %c0_58 = arith.constant 0 : index
    %151 = vector.load %arg13[%c0_57, %c0_58] : memref<64x32xf32, #tpu.memory_space<vmem>>, vector<64x32xf32>
    %cst_59 = arith.constant dense<0.000000e+00> : vector<8x32xf32>
    %152 = tpu.matmul %150, %151, %cst_59 {dimension_numbers = #tpu.dot_dimension_numbers<[1], [0], [0], [1], [0, 0, 1, 1], [], []>} : vector<8x64xf32>, vector<64x32xf32>, vector<8x32xf32> -> vector<8x32xf32>
    %153 = arith.addf %119, %152 : vector<8x32xf32>
    %c0_60 = arith.constant 0 : index
    %c0_61 = arith.constant 0 : index
    %154 = vector.load %arg14[%c0_60, %c0_61] : memref<1x32xf32, #tpu.memory_space<vmem>>, vector<1x32xf32>
    %155 = vector.broadcast %154 : vector<1x32xf32> to vector<8x32xf32>
    %156 = arith.addf %153, %155 : vector<8x32xf32>
    %c0_62 = arith.constant 0 : index
    %c0_63 = arith.constant 0 : index
    %c0_64 = arith.constant 0 : index
    %157 = vector.load %arg15[%c0_62, %c0_63, %c0_64] : memref<1x8x32xf32, #tpu.memory_space<vmem>>, vector<1x8x32xf32>
    %158 = vector.shape_cast %157 : vector<1x8x32xf32> to vector<8x32xf32>
    %159 = vector.shape_cast %156 : vector<8x32xf32> to vector<1x8x32xf32>
    tpu.vector_store %arg15[%c0_62, %c0_63, %c0_64], %159 {strides = array<i32>} : memref<1x8x32xf32, #tpu.memory_space<vmem>>, vector<1x8x32xf32>,
    return
  }
  func.func @transform_0(%arg0: i32) -> (i32, i32, i32) {
    %c0_i32 = arith.constant 0 : i32
    %c0_i32_0 = arith.constant 0 : i32
    %c0_i32_1 = arith.constant 0 : i32
    return %arg0, %c0_i32, %c0_i32_0 : i32, i32, i32
  }
  func.func @transform_1(%arg0: i32) -> (i32, i32, i32) {
    %c0_i32 = arith.constant 0 : i32
    %c0_i32_0 = arith.constant 0 : i32
    %c0_i32_1 = arith.constant 0 : i32
    return %arg0, %c0_i32, %c0_i32_0 : i32, i32, i32
  }
  func.func @transform_2(%arg0: i32) -> (i32, i32) {
    %c0_i32 = arith.constant 0 : i32
    %c0_i32_0 = arith.constant 0 : i32
    %c0_i32_1 = arith.constant 0 : i32
    return %c0_i32, %c0_i32_0 : i32, i32
  }
  func.func @transform_3(%arg0: i32) -> (i32, i32) {
    %c0_i32 = arith.constant 0 : i32
    %c0_i32_0 = arith.constant 0 : i32
    %c0_i32_1 = arith.constant 0 : i32
    return %c0_i32, %c0_i32_0 : i32, i32
  }
  func.func @transform_4(%arg0: i32) -> (i32, i32) {
    %c0_i32 = arith.constant 0 : i32
    %c0_i32_0 = arith.constant 0 : i32
    %c0_i32_1 = arith.constant 0 : i32
    return %c0_i32, %c0_i32_0 : i32, i32
  }
  func.func @transform_5(%arg0: i32) -> (i32, i32) {
    %c0_i32 = arith.constant 0 : i32
    %c0_i32_0 = arith.constant 0 : i32
    %c0_i32_1 = arith.constant 0 : i32
    return %c0_i32, %c0_i32_0 : i32, i32
  }
  func.func @transform_6(%arg0: i32) -> (i32, i32) {
    %c0_i32 = arith.constant 0 : i32
    %c0_i32_0 = arith.constant 0 : i32
    %c0_i32_1 = arith.constant 0 : i32
    return %c0_i32, %c0_i32_0 : i32, i32
  }
  func.func @transform_7(%arg0: i32) -> (i32, i32) {
    %c0_i32 = arith.constant 0 : i32
    %c0_i32_0 = arith.constant 0 : i32
    %c0_i32_1 = arith.constant 0 : i32
    return %c0_i32, %c0_i32_0 : i32, i32
  }
  func.func @transform_8(%arg0: i32) -> (i32, i32) {
    %c0_i32 = arith.constant 0 : i32
    %c0_i32_0 = arith.constant 0 : i32
    %c0_i32_1 = arith.constant 0 : i32
    return %c0_i32, %c0_i32_0 : i32, i32
  }
  func.func @transform_9(%arg0: i32) -> (i32, i32) {
    %c0_i32 = arith.constant 0 : i32
    %c0_i32_0 = arith.constant 0 : i32
    %c0_i32_1 = arith.constant 0 : i32
    return %c0_i32, %c0_i32_0 : i32, i32
  }
  func.func @transform_10(%arg0: i32) -> (i32, i32) {
    %c0_i32 = arith.constant 0 : i32
    %c0_i32_0 = arith.constant 0 : i32
    %c0_i32_1 = arith.constant 0 : i32
    return %c0_i32, %c0_i32_0 : i32, i32
  }
  func.func @transform_11(%arg0: i32) -> (i32, i32) {
    %c0_i32 = arith.constant 0 : i32
    %c0_i32_0 = arith.constant 0 : i32
    %c0_i32_1 = arith.constant 0 : i32
    return %c0_i32, %c0_i32_0 : i32, i32
  }
  func.func @transform_12(%arg0: i32) -> (i32, i32) {
    %c0_i32 = arith.constant 0 : i32
    %c0_i32_0 = arith.constant 0 : i32
    %c0_i32_1 = arith.constant 0 : i32
    return %c0_i32, %c0_i32_0 : i32, i32
  }
  func.func @transform_13(%arg0: i32) -> (i32, i32) {
    %c0_i32 = arith.constant 0 : i32
    %c0_i32_0 = arith.constant 0 : i32
    %c0_i32_1 = arith.constant 0 : i32
    return %c0_i32, %c0_i32_0 : i32, i32
  }
  func.func @transform_14(%arg0: i32) -> (i32, i32, i32) {
    %c0_i32 = arith.constant 0 : i32
    %c0_i32_0 = arith.constant 0 : i32
    %c0_i32_1 = arith.constant 0 : i32
    return %arg0, %c0_i32, %c0_i32_0 : i32, i32, i32
  }
}

</mosaic_0001>

<bundles_post_ra>
// kernel: tpu_custom_call.1
= control target key start
LH: loop header
LB: loop body
LE: loop exit
PB: predicated region body
PF: predicated region fallthrough
CT: control target
= control target key end

     0   :  { %s2810_s0 = inlined_call_operand.vmem [shape: f32[4,8,32], index: 0, kind: input, shape index: {}]   ;;  %s2811_s1 = inlined_call_operand.hbm [shape: f32[4,1,8], index: 1, kind: input, shape index: {}]   ;;  %s2812_s2 = inlined_call_operand.vmem [shape: f32[1,32], index: 2, kind: input, shape index: {}]   ;;  %s2813_s3 = inlined_call_operand.vmem [shape: f32[1,32], index: 3, kind: input, shape index: {}]   ;;  %s2814_s4 = inlined_call_operand.vmem [shape: f32[32,96], index: 4, kind: input, shape index: {}]   ;;  %s2815_s5 = inlined_call_operand.vmem [shape: f32[1,96], index: 5, kind: input, shape index: {}]   ;;  %s2816_s6 = inlined_call_operand.vmem [shape: f32[32,32], index: 6, kind: input, shape index: {}]   ;;  %s2817_s7 = inlined_call_operand.vmem [shape: f32[1,32], index: 7, kind: input, shape index: {}]   ;;  %s2818_s8 = inlined_call_operand.vmem [shape: f32[1,32], index: 8, kind: input, shape index: {}]   ;;  %s2819_s9 = inlined_call_operand.vmem [shape: f32[1,32], index: 9, kind: input, shape index: {}]   ;;  %s2820_s10 = inlined_call_operand.hbm [shape: f32[32,64], index: 10, kind: input, shape index: {}]   ;;  %s2821_s11 = inlined_call_operand.vmem [shape: f32[1,64], index: 11, kind: input, shape index: {}]   ;;  %s2822_s12 = inlined_call_operand.vmem [shape: f32[64,32], index: 12, kind: input, shape index: {}]   ;;  %s2823_s13 = inlined_call_operand.vmem [shape: f32[1,32], index: 13, kind: input, shape index: {}]   ;;  %s2824_s14 = inlined_call_operand.hbm [shape: f32[4,8,32], index: 14, kind: output, shape index: {}]  }
   0x1   :  { %2833 = sst [smem:[#allocation14_spill]] %s2819_s9 }
   0x2   :  { %2834 = sst [smem:[#allocation15_spill]] %s2821_s11 }
   0x3   :  { %2835 = sst [smem:[#allocation16_spill]] %s2823_s13 }
   0x4   :  { %2836 = sst [smem:[#allocation17_spill]] %s2824_s14 }
   0x5   :  { %19 = vsyncpa [#allocation3], 0 }
   0x6   :  { %21 = vsyncpa [#allocation3 + $0x1], 0 }
   0x7   :  { %22 = vsyncpa [#allocation6], 0 }
   0x8   :  { %23 = vsyncpa [#allocation4], 0 }
   0x9   :  { %25 = vsyncpa [#allocation4 + $0x1], 0  ;;  %s2437_s29 = smov 0   ;;  %s2439_s30 = smov 0  }
   0xa   :  { %s2441_s15 = smov 0   ;;  %s2443_s16 = smov 0  }
   0xb LB: > { %2837 = sst [smem:[#allocation11_spill]] %s2329_s29  ;;  %s2458_s17 = sadd.s32 4294967295, %s2341_s16   ;;  %s2341_s16 = sphi %s2443_s16, %s2858_s16   ;;  %s2337_s15 = sphi %s2441_s15, %s2861_s15   ;;  %s2333_s30 = sphi %s2439_s30, %s2860_s30   ;;  %s2329_s29 = sphi %s2437_s29, %s2859_s29  }
   0xc   : > { %s1911_s18 = sadd.s32 4294967294, %s2341_s16   ;;  %p77_p0 = scmp.ne.s32.totalorder %s2333_s30, %s2329_s29 }
   0xd   : > { %p2828_p1 = scmp.eq.s32.totalorder %s2458_s17, 0  ;;  %p359_p3 = scmp.eq.s32.totalorder %s1911_s18, 3 }
   0xe   : > { %p1912_p5 = scmp.ge.s32.totalorder %s2341_s16, 1  ;;  %p366_p7 = scmp.lt.s32.totalorder %s2341_s16, 5 }
   0xf   : > { %p2467_p4 = por %p2828_p1, %p77_p0  ;;  %p2472_p6 = por %p359_p3, %p77_p0 }
  0x10   : > { %p2477_p8 = pnand %p1912_p5, %p366_p7  ;;  %s2343_s22 = smov [#allocation5]  }
  0x11   : > { %s2838_s19 = scalar_select %p2467_p4, 1, 0 }
  0x12   : > { %s2839_s20 = scalar_select %p2472_p6, 1, 0 }
  0x13   : > { %s2841_s21 = scalar_select %p2477_p8, 1, 0 }
  0x14   : > { %2840 = sst [smem:[#allocation12_spill]] %s2839_s20  ;;  %s402_s23 = sshll.u32 %s2343_s22, 4  ;;  %s403_s23 = int_to_ptr.vmem [resolvable:$true] %s402_s23 }
  0x15   : > { %p2128_p9 = pneg %p2477_p8  ;;  %s2490_s25 = sadd.s32 1, %s2341_s16  }
  0x16   : > { %2843 = sst [smem:[#allocation13_spill]] %s2490_s25  ;;  %s64_s26 = sadd.s32 1, %s2337_s15 }
  0x17   : > { %p2485_p10 = pnand %p2128_p9, %p2828_p1  ;;  %s61_s27 = ssub.s32 %s2341_s16, %s2490_s25 }
  0x18   : > { %s2213_s20 = scalar_lea.hbm %s2820_s10, 512 }
  0x19   : > { %p2214_p11 = scmp.ne.s32.totalorder %s2820_s10, %s2213_s20  ;;  %p2215_p12 = pneg %p2485_p10 }
  0x1a   : > { %p2220_p3 = scmp.lt.u32.totalorder %s2213_s20, %s2820_s10 }
  0x1b   : > { %p2216_p13 = pnand %p2215_p12, %p2214_p11 }
  0x1d   : > { %p2217_p0 = pneg %p2216_p13 }
  0x1f   : > { %p2222_p5 = pnand %p2220_p3, %p2217_p0 }
  0x21   : > { %2225 = shalt.err (!%p2222_p5)
}
  0x22   : > { %s2226_s11 = scalar_lea.vmem %s403_s23, 512  ;;  %p2234_p2 = scmp.lt.s32.totalorder %s403_s23, %s403_s23 }
  0x23   : > { %p2227_p7 = scmp.ne.s32.totalorder %s403_s23, %s2226_s11  ;;  %p2235_p6 = scmp.lt.s32.totalorder %s2226_s11, %s2226_s11 }
  0x25   : > { %p2229_p9 = pnand %p2227_p7, %p2215_p12  ;;  %p2236_p4 = por %p2235_p6, %p2234_p2 }
  0x27   : > { %p2230_p1 = pneg %p2229_p9 }
  0x29   : > { %p2237_p8 = pnand %p2236_p4, %p2230_p1 }
  0x2b   : > { %2240 = shalt.err (!%p2237_p8)
}
  0x2c   : > { %s2344_s29 = smov 128   ;;  %s2345_s13 = smov 8  }
  0x2d   : > { %2131 = dma.hbm_to_vmem [thread:$0]  (!%p2485_p10), %s2820_s10, 512, %s403_s23, [#allocation6], %s2344_s29, %s2344_s29, %s2345_s13  }
  0x2e   : > { %p62_p11 = scmp.eq.s32.totalorder %s61_s27, 0  ;;  %p71_p2 = scmp.ne.s32.totalorder %s2337_s15, %s2333_s30 }
  0x2f   : > { %p72_p1 = scmp.eq.s32.totalorder %s2341_s16, 0  ;;  %p2141_p4 = scmp.lt.s32.totalorder %s2341_s16, 4 }
  0x30   : > { %s2516_s11 = scalar_select %p62_p11, %s2337_s15, %s64_s26  }
  0x31   : > { %p73_p6 = por %p72_p1, %p71_p2  ;;  %p2844_p8 = scmp.eq.s32.totalorder %s2458_s17, 3 }
  0x32   : > { %s432_s18 = sand.u32 1, %s2337_s15   ;;  %s1915_s22 = sshll.u32 %s2341_s16, 4 }
  0x33   : > { %p2520_p12 = por %p2844_p8, %p71_p2  ;;  %s2529_s9 = scalar_lea.hbm %s2811_s1, %s1915_s22 }
  0x34   : > { %s435_s23 = scalar_lea.vmem [#allocation2], %s432_s18  ;;  %p2533_p10 = pnand %p2141_p4, %p73_p6 }
  0x35   : > { %s442_s26 = sshll.u32 %s435_s23, 4  ;;  %s433_s29 = scalar_lea.sflag [#allocation3], %s432_s18  ;;  %s2531_s26 = int_to_ptr.vmem [resolvable:$true] %s442_s26 }
  0x36   : > { %s2241_s13 = scalar_lea.hbm %s2529_s9, 16  ;;  %p2243_p0 = pneg %p2533_p10 }
  0x37   : > { %p2242_p13 = scmp.ne.s32.totalorder %s2529_s9, %s2241_s13  ;;  %s2246_s20 = scalar_lea.hbm %s2811_s1, 64 }
  0x38   : > { %p2247_p7 = scmp.lt.u32.totalorder %s2529_s9, %s2811_s1  ;;  %p2248_p9 = scmp.lt.u32.totalorder %s2246_s20, %s2241_s13 }
  0x39   : > { %p2244_p3 = pnand %p2243_p0, %p2242_p13  ;;  %p2250_p2 = scmp.lt.u32.totalorder %s2241_s13, %s2529_s9 }
  0x3a   : > { %p2249_p11 = por %p2248_p9, %p2247_p7 }
  0x3b   : > { %p2245_p5 = pneg %p2244_p3 }
  0x3c   : > { %p2251_p1 = por %p2250_p2, %p2249_p11 }
  0x3e   : > { %p2252_p4 = pnand %p2251_p1, %p2245_p5 }
  0x40   : > { %2255 = shalt.err (!%p2252_p4)
}
  0x41   : > { %s2256_s18 = scalar_lea.vmem %s2531_s26, 16  ;;  %s2346_s23 = smov [#allocation2]  }
  0x42   : > { %p2257_p6 = scmp.ne.s32.totalorder %s2531_s26, %s2256_s18  ;;  %s2261_s25 = sshll.u32 %s2346_s23, 4  ;;  %s2262_s25 = int_to_ptr.vmem [resolvable:$false] %s2261_s25 }
  0x43   : > { %s2263_s14 = scalar_lea.vmem %s2262_s25, 32  ;;  %p2264_p3 = scmp.lt.s32.totalorder %s2531_s26, %s2262_s25 }
  0x44   : > { %p2259_p8 = pnand %p2257_p6, %p2243_p0  ;;  %p2265_p7 = scmp.lt.s32.totalorder %s2263_s14, %s2256_s18 }
  0x46   : > { %p2260_p13 = pneg %p2259_p8  ;;  %p2266_p9 = por %p2265_p7, %p2264_p3 }
  0x48   : > { %p2267_p11 = pnand %p2266_p9, %p2260_p13 }
  0x4a   : > { %2270 = shalt.err (!%p2267_p11)
}
  0x4b   : > { %2135 = dma.hbm_to_vmem [thread:$0]  (!%p2533_p10), %s2529_s9, 16, %s2531_s26, %s433_s29  }
  0x4c   : > { %p2847_p5 = scmp.ne.s32.totalorder %s2841_s21, 0 }
  0x4d   : > { %s2565_s13 = sand.u32 (!%p2847_p5), 1, %s2333_s30   ;;  %p2848_p0 = scmp.ne.s32.totalorder (!%p2847_p5), %s2838_s19, 0 }
  0x4e   : > { %451 = sbr.rel (%p2847_p5) target bundleno = 3738 (0xe9a), region = 76  ;;  %s454_s20 = scalar_lea.sflag (!%p2847_p5), [#allocation3], %s2565_s13 }
  0x4f   : > { %s456_s22 = scalar_lea.vmem (!%p2847_p5), [#allocation2], %s2565_s13 }
  0x55   : > { %2316 = dma.done.wait (%p2848_p0), %s454_s20, 16  }
  0x56   : > { %2318 = vsyncadd (%p2848_p0), %s454_s20, 4294967280  ;;  %p2849_p2 = scmp.eq.s32.totalorder %s2458_s17, 0 }
  0x58   : > { %2320 = dma.done.wait (%p2849_p2), [#allocation6], 512   ;;  %p2850_p10 = pmov %p2849_p2 }
  0x59   : > { %p508_p1 = scmp.lt.s32.totalorder %s2458_s17, 3  ;;  %vm516_vm0 = vcmask 261120   ;;  %v545_v7 = vld [vmem:[%s2814_s4] sm:$0xff]  ;;  %v546_v8 = vld [vmem:[%s2814_s4 + $0x8] sm:$0xff]  ;;  %v547_v9 = vld [vmem:[%s2814_s4 + $0x10] sm:$0xff]  ;;  %v2347_v10 = vmov 0.0|0.0  }
  0x5a   : > { %2322 = vsyncadd (%p2850_p10), [#allocation6], 4294966784  ;;  %2096 = vmatprep.subr.bf16.mxu0 %v2347_v10  ;;  %v2097_v11 = vpack.c.bf16 %v546_v8, %v545_v7  ;;  %v548_v12 = vld [vmem:[%s2814_s4 + $0x18] sm:$0xff]  ;;  %vm2348_vm1 = vmmov 0   ;;  %v2349_v13 = vmov 0.0   ;;  %s2350_s18 = smov 120  }
  0x5b   : > { %s509_s9 = scalar_select %p508_p1, %s2458_s17, 3  ;;  %2003 = vmatprep.mubr.msk.f32.mxu0 %vm2348_vm1, %v2349_v13  ;;  %2011 = vmatprep.subr.mxu1 %v2349_v13  ;;  %v2100_v14 = vpack.c.bf16 %v548_v12, %v547_v9  ;;  %v1920_v19 = vld [vmem:[%s2812_s2] ss:$0 sm:$0xff]  ;;  %vm642_vm2 = vcmask 64512   ;;  %v630_v50 = vld [vmem:[%s2816_s6 + $0x8] sm:$0xff]  ;;  %vm1724_vm3 = vcmask 523264  }
  0x5c   : > { %2013 = vmatprep.mubr.msk.f32.mxu1 %vm2348_vm1, %v2349_v13  ;;  %2098 = vmatpush3.bf16.msra.mxu0 %v2097_v11  ;;  %v1921_v21 = vld [vmem:[%s2813_s3] ss:$0 sm:$0xff]  ;;  %s2351_s23 = smov 96   ;;  %s2352_s25 = smov 88  }
  0x5d   : > { %s1919_s21 = sshll.u32 %s509_s9, 3  ;;  %2099 = vmatprep.subr.bf16.mxu0 %v2347_v10  ;;  %v1922_v24 = vld [vmem:[%s2815_s5] ss:$0 sm:$0xff]  ;;  %s2353_s14 = smov 56  }
  0x5e   : > { %s511_s29 = scalar_lea.vmem %s2810_s0, %s1919_s21  ;;  %v2638_v31 = vld [vmem:[%s456_s22] ss:$0 sm:$0xff]  ;;  %s2354_s22 = smov 64  }
  0x5f   : > { %v2582_v0 = vld [vmem:[%s511_s29] sm:$0xff]  ;;  %s2355_s20 = smov 80   ;;  %s2356_s9 = smov 112  }
  0x60   : > { %v517_v1 = vsel %vm516_vm0, %v2582_v0, 0.0  ;;  %2101 = vmatpush3.bf16.msra.mxu0 %v2100_v14  ;;  %v629_v59 = vld [vmem:[%s2816_s6] sm:$0xff]  ;;  %s2357_s19 = smov 48   ;;  %s2358_s24 = smov 104  }
  0x61   : > { %518 = vadd.xlane.f32.xlu0 %v517_v1  ;;  %2006 = vmatprep.subr.mxu0 %v2349_v13  ;;  %s2853_s27 = sld [smem:[#allocation16_spill]]  ;;  %s1949_s29 = sshll.u32 %s2458_s17, 7 }
  0x62   : > { %s2361_s17 = smov [#allocation7]  }
  0xee   : > { %v519_v2 = vpop.xlane.xlu0 %518 }
  0xef   : > { %v521_v3 = vmul.f32 0.03125, %v519_v2 }
  0xf1   : > { %v522_v4 = vsub.f32 %v2582_v0, %v521_v3 }
  0xf3   : > { %v523_v5 = vmul.f32 %v522_v4, %v522_v4 }
  0xf5   : > { %v524_v6 = vsel %vm516_vm0, %v523_v5, 0.0 }
  0xf6   : > { %525 = vadd.xlane.f32.xlu0 %v524_v6 }
 0x183   : > { %v526_v15 = vpop.xlane.xlu0 %525 }
 0x184   : > { %v527_v16 = vmul.f32 0.03125, %v526_v15 }
 0x186   : > { %v528_v17 = vadd.f32 1e-06, %v527_v16 }
 0x188   : > { %2193 = vrsqrt.f32 %v528_v17 }
 0x192   : > { %v2194_v18 = vpop.eup %2193 }
 0x193   : > { %v530_v20 = vmul.f32 %v2194_v18, %v522_v4 }
 0x195   : > { %v537_v22 = vmul.f32 %v1920_v19, %v530_v20 }
 0x197   : > { %v544_v23 = vadd.f32 %v1921_v21, %v537_v22 }
 0x199   : > { %2004 = vmatmul.mubr.msk.f32.vlgmr.msra.gmra.mrb[0].mxu0 %vm516_vm0, %v544_v23 }
 0x19a   : > { %2008 = vmatprep.mubr.msk.f32.mxu0 %vm2348_vm1, %v2349_v13 }
 0x26c   : > { %v625_v25 = vpop.f32.mrb[0].mxu0 }
 0x26d   : > { %v2620_v26 = vadd.f32 %v1922_v24, %v625_v25  ;;  %v2005_v27 = vpop.f32.mrb[1].mxu0  ;;  %v631_v25 = vld [vmem:[%s2816_s6 + $0x10] sm:$0xff] }
 0x26f   : > { %804 = vrot.lane.b32.xlu0 %v2620_v26, %s2350_s18  ;;  %640 = vrot.lane.b32.xlu1 %v2620_v26, %s2351_s23  ;;  %s2359_s18 = smov 72  }
 0x273   : > { %806 = vrot.lane.b32.xlu1 %v2620_v26, %s2352_s25  ;;  %s2854_s25 = sld [smem:[#allocation17_spill]] }
 0x2e1   : > { %v641_v28 = vpop.permute.xlu1 %640  ;;  %v805_v30 = vpop.permute.xlu0 %804 }
 0x2e2   : > { %2007 = vmatpush3.xpose.msk.msra.mxu0 %vm642_vm2, %v641_v28 }
 0x2e3   : > { %2016 = vmatprep.subr.mxu0 %v2349_v13 }
 0x2e5   : > { %2009 = vmatmul.mubr.msk.f32.vlgmr.msra.gmra.mrb[2].mxu0 %vm642_vm2, %v2620_v26  ;;  %v807_v29 = vpop.permute.xlu1 %806 }
 0x2e6   : > { %2017 = vmatpush3.xpose.msk.msra.mxu0 %vm642_vm2, %v807_v29  ;;  %2018 = vmatprep.mubr.msk.f32.mxu0 %vm2348_vm1, %v2349_v13 }
 0x2e7   : > { %2026 = vmatprep.subr.mxu0 %v2349_v13 }
 0x2e9   : > { %2019 = vmatmul.mubr.msk.f32.vlgmr.msra.gmra.mrb[4].mxu0 %vm642_vm2, %v805_v30 }
 0x2ea   : > { %2028 = vmatprep.mubr.msk.f32.mxu0 %vm2348_vm1, %v2349_v13  ;;  %2027 = vmatpush3.msra.mxu0 %v630_v50  ;;  %v1941_v50 = vld [vmem:[%s2817_s7] ss:$0 sm:$0xff] }
 0x2eb   : > { %2036 = vmatprep.subr.mxu0 %v2349_v13 }
 0x3b8   : > { %v713_v32 = vpop.f32.mrb[2].mxu0 }
 0x3b9   : > { %v714_v33 = vadd.f32 %v2638_v31, %v713_v32  ;;  %v2010_v34 = vpop.f32.mrb[3].mxu0 }
 0x3bb   : > { %v717_v35 = vsel %vm642_vm2, %v714_v33, -inf }
 0x3bc   : > { %718 = vmax.xlane.f32.xlu1 %v717_v35  ;;  %v878_v36 = vpop.f32.mrb[4].mxu0 }
 0x3bd   : > { %v879_v37 = vadd.f32 %v2638_v31, %v878_v36  ;;  %v2020_v38 = vpop.f32.mrb[5].mxu0 }
 0x3bf   : > { %v882_v39 = vsel %vm642_vm2, %v879_v37, -inf }
 0x3c0   : > { %883 = vmax.xlane.f32.xlu0 %v882_v39  ;;  %v632_v39 = vld [vmem:[%s2816_s6 + $0x18] sm:$0xff] }
 0x3d6   : > { %893 = vrot.lane.b32.xlu0 %v2620_v26, %s2353_s14  ;;  %s2360_s14 = smov 40  }
 0x449   : > { %v719_v40 = vpop.xlane.xlu1 %718 }
 0x44a   : > { %v720_v41 = vsub.f32 %v714_v33, %v719_v40 }
 0x44c   : > { %v721_v42 = vmul.f32 1.442695, %v720_v41 }
 0x44d   : > { %v884_v43 = vpop.xlane.xlu0 %883 }
 0x44e   : > { %2195 = vpow2.f32 %v721_v42  ;;  %v885_v44 = vsub.f32 %v879_v37, %v884_v43 }
 0x450   : > { %v886_v45 = vmul.f32 1.442695, %v885_v44 }
 0x451   : > { %v894_v56 = vpop.permute.xlu0 %893 }
 0x452   : > { %2197 = vpow2.f32 %v886_v45 }
 0x458   : > { %v2196_v46 = vpop.eup %2195 }
 0x459   : > { %v723_v47 = vsel %vm642_vm2, %v2196_v46, 0.0 }
 0x45a   : > { %724 = vadd.xlane.f32.xlu1 %v723_v47 }
 0x45c   : > { %v2198_v48 = vpop.eup %2197 }
 0x45d   : > { %v888_v49 = vsel %vm642_vm2, %v2198_v48, 0.0 }
 0x45e   : > { %889 = vadd.xlane.f32.xlu1 %v888_v49 }
 0x46f   : > { %728 = vrot.lane.b32.xlu1 %v2620_v26, %s2354_s22  ;;  %s1809_s22 = scalar_lea.sflag [#allocation4], %s2565_s13 }
 0x473   : > { %1117 = vrot.lane.b32.xlu1 %v2620_v26, %s2355_s20  ;;  %s2852_s20 = sld [smem:[#allocation15_spill]] }
 0x477   : > { %1115 = vrot.lane.b32.xlu1 %v2620_v26, %s2356_s9  ;;  %s1918_s9 = sshll.u32 %s2565_s13, 3 }
 0x4e7   : > { %v725_v51 = vpop.xlane.xlu1 %724 }
 0x4e8   : > { %2199 = vrcp.f32 %v725_v51 }
 0x4eb   : > { %v890_v52 = vpop.xlane.xlu1 %889 }
 0x4ec   : > { %2201 = vrcp.f32 %v890_v52 }
 0x4ef   : > { %v729_v53 = vpop.permute.xlu1 %728 }
 0x4f0   : > { %2012 = vmatpush3.msra.mxu1 %v729_v53 }
 0x4f1   : > { %2021 = vmatprep.subr.mxu1 %v2349_v13 }
 0x4f2   : > { %v2200_v54 = vpop.eup %2199 }
 0x4f3   : > { %v727_v55 = vmul.f32 %v2200_v54, %v2196_v46  ;;  %v1118_v62 = vpop.permute.xlu1 %1117 }
 0x4f5   : > { %2014 = vmatmul.mubr.msk.f32.vlgmr.msra.gmra.mrb[0].mxu1 %vm642_vm2, %v727_v55 }
 0x4f6   : > { %v2202_v57 = vpop.eup %2201  ;;  %2022 = vmatpush3.msra.mxu1 %v894_v56  ;;  %2023 = vmatprep.mubr.msk.f32.mxu1 %vm2348_vm1, %v2349_v13 }
 0x4f7   : > { %v892_v58 = vmul.f32 %v2202_v57, %v2198_v48  ;;  %2031 = vmatprep.subr.mxu1 %v2349_v13  ;;  %v1116_v2 = vpop.permute.xlu1 %1115 }
 0x4f9   : > { %2024 = vmatmul.mubr.msk.f32.vlgmr.msra.gmra.mrb[2].mxu1 %vm642_vm2, %v892_v58 }
 0x4fa   : > { %2033 = vmatprep.mubr.msk.f32.mxu1 %vm2348_vm1, %v2349_v13  ;;  %2032 = vmatpush3.msra.mxu1 %v629_v59  ;;  %v1632_v59 = vld [vmem:[#allocation5 + $0x8] sm:$0xff] }
 0x4fb   : > { %2041 = vmatprep.subr.mxu1 %v2349_v13 }
 0x5c8   : > { %v800_v60 = vpop.f32.mrb[0].mxu1 }
 0x5c9   : > { %v2015_v61 = vpop.f32.mrb[1].mxu1  ;;  %2034 = vmatmul.mubr.msk.f32.vlgmr.msra.gmra.mrb[4].mxu1 %vm642_vm2, %v800_v60 }
 0x5ca   : > { %2043 = vmatprep.mubr.msk.f32.mxu1 %vm2348_vm1, %v2349_v13  ;;  %v1633_v61 = vld [vmem:[#allocation5 + $0x10] sm:$0xff] }
 0x5cc   : > { %v965_v63 = vpop.f32.mrb[2].mxu1 }
 0x5cd   : > { %v2025_v1 = vpop.f32.mrb[3].mxu1  ;;  %2029 = vmatmul.mubr.msk.f32.vlgmr.msra.gmra.mrb[6].mxu0 %vm642_vm2, %v965_v63  ;;  %v1716_v63 = vld [vmem:[%s2822_s12] sm:$0xff] }
 0x5ce   : > { %2037 = vmatpush3.xpose.msk.msra.mxu0 %vm642_vm2, %v1118_v62  ;;  %2038 = vmatprep.mubr.msk.f32.mxu0 %vm2348_vm1, %v2349_v13  ;;  %v1634_v62 = vld [vmem:[#allocation5 + $0x18] sm:$0xff]  ;;  %v1717_v1 = vld [vmem:[%s2822_s12 + $0x8] sm:$0xff] }
 0x5cf   : > { %2046 = vmatprep.subr.mxu0 %v2349_v13 }
 0x5d1   : > { %2039 = vmatmul.mubr.msk.f32.vlgmr.msra.gmra.mrb[8].mxu0 %vm642_vm2, %v1116_v2  ;;  %v1718_v2 = vld [vmem:[%s2822_s12 + $0x10] sm:$0xff] }
 0x5d2   : > { %2048 = vmatprep.mubr.msk.f32.mxu0 %vm2348_vm1, %v2349_v13  ;;  %2047 = vmatpush3.msra.mxu0 %v631_v25 }
 0x5d3   : > { %2056 = vmatprep.subr.mxu0 %v2349_v13 }
 0x69c   : > { %v1111_v3 = vpop.f32.mrb[4].mxu1 }
 0x69d   : > { %v2035_v4 = vpop.f32.mrb[5].mxu1 }
 0x69e   : > { %v1719_v4 = vld [vmem:[%s2822_s12 + $0x18] sm:$0xff] }
 0x6a0   : > { %v1038_v5 = vpop.f32.mrb[6].mxu0 }
 0x6a1   : > { %v1112_v6 = vadd.f32 %v1111_v3, %v1038_v5  ;;  %v2030_v7 = vpop.f32.mrb[7].mxu0  ;;  %v2109_v3 = vpack.c.bf16 %v1717_v1, %v1716_v63  ;;  %v2112_v5 = vpack.c.bf16 %v1719_v4, %v1718_v2 }
 0x6a2   : > { %v1721_v7 = vld [vmem:[%s2822_s12 + $0x28] sm:$0xff] }
 0x6a4   : > { %v1189_v8 = vpop.f32.mrb[8].mxu0 }
 0x6a5   : > { %v1190_v9 = vadd.f32 %v2638_v31, %v1189_v8  ;;  %v2040_v11 = vpop.f32.mrb[9].mxu0 }
 0x6a7   : > { %v1193_v12 = vsel %vm642_vm2, %v1190_v9, -inf }
 0x6a8   : > { %1194 = vmax.xlane.f32.xlu1 %v1193_v12 }
 0x6b9   : > { %1204 = vrot.lane.b32.xlu1 %v2620_v26, %s2357_s19  ;;  %s2851_s19 = sld [smem:[#allocation14_spill]] }
 0x6bd   : > { %1354 = vrot.lane.b32.xlu1 %v2620_v26, %s2358_s24 }
 0x735   : > { %v1195_v14 = vpop.xlane.xlu1 %1194 }
 0x736   : > { %v1196_v15 = vsub.f32 %v1190_v9, %v1195_v14 }
 0x738   : > { %v1197_v16 = vmul.f32 1.442695, %v1196_v15  ;;  %v1942_v15 = vld [vmem:[%s2818_s8] ss:$0 sm:$0xff] }
 0x739   : > { %v1205_v17 = vpop.permute.xlu1 %1204 }
 0x73a   : > { %2203 = vpow2.f32 %v1197_v16  ;;  %2042 = vmatpush3.msra.mxu1 %v1205_v17  ;;  %v1943_v17 = vld [vmem:[%s2851_s19] ss:$0 sm:$0xff]  ;;  %s507_s19 = scalar_lea.vmem [#allocation7], %s1918_s9  ;;  %s2275_s9 = sshll.u32 %s2361_s17, 4  ;;  %s2276_s9 = int_to_ptr.vmem [resolvable:$false] %s2275_s9 }
 0x73b   : > { %2051 = vmatprep.subr.mxu1 %v2349_v13  ;;  %s1822_s24 = sshll.u32 %s507_s19, 4  ;;  %s2277_s21 = scalar_lea.vmem %s2276_s9, 256  ;;  %s2768_s24 = int_to_ptr.vmem [resolvable:$true] %s1822_s24 }
 0x73c   : > { %p2278_p13 = scmp.lt.s32.totalorder %s2768_s24, %s2276_s9 }
 0x73d   : > { %v1355_v24 = vpop.permute.xlu1 %1354 }
 0x744   : > { %v2204_v18 = vpop.eup %2203 }
 0x745   : > { %v1199_v19 = vsel %vm642_vm2, %v2204_v18, 0.0 }
 0x746   : > { %1200 = vadd.xlane.f32.xlu0 %v1199_v19 }
 0x75c   : > { %1356 = vrot.lane.b32.xlu0 %v2620_v26, %s2359_s18 }
 0x7d3   : > { %v1201_v20 = vpop.xlane.xlu0 %1200 }
 0x7d4   : > { %2205 = vrcp.f32 %v1201_v20  ;;  %v1723_v20 = vld [vmem:[%s2822_s12 + $0x38] sm:$0xff] }
 0x7d7   : > { %v1357_v23 = vpop.permute.xlu0 %1356 }
 0x7de   : > { %v2206_v21 = vpop.eup %2205 }
 0x7df   : > { %v1203_v22 = vmul.f32 %v2206_v21, %v2204_v18 }
 0x7e1   : > { %2044 = vmatmul.mubr.msk.f32.vlgmr.msra.gmra.mrb[6].mxu1 %vm642_vm2, %v1203_v22  ;;  %v1944_v22 = vld [vmem:[%s2852_s20] ss:$0 sm:$0xff]  ;;  %s2271_s20 = scalar_lea.vmem %s2768_s24, 128 }
 0x7e2   : > { %2052 = vmatpush3.xpose.msk.msra.mxu1 %vm642_vm2, %v1357_v23  ;;  %2053 = vmatprep.mubr.msk.f32.mxu1 %vm2348_vm1, %v2349_v13  ;;  %p2272_p4 = scmp.ne.s32.totalorder %s2768_s24, %s2271_s20  ;;  %p2279_p3 = scmp.lt.s32.totalorder %s2277_s21, %s2271_s20 }
 0x7e3   : > { %2061 = vmatprep.subr.mxu1 %v2349_v13 }
 0x7e4   : > { %p2273_p6 = pnand %p2272_p4, %p2520_p12  ;;  %p2280_p7 = por %p2279_p3, %p2278_p13 }
 0x7e5   : > { %2054 = vmatmul.mubr.msk.f32.vlgmr.msra.gmra.mrb[8].mxu1 %vm642_vm2, %v1355_v24 }
 0x7e6   : > { %2063 = vmatprep.mubr.msk.f32.mxu1 %vm2348_vm1, %v2349_v13  ;;  %2062 = vmatpush3.msra.mxu1 %v632_v39  ;;  %p2274_p8 = pneg %p2273_p6 }
 0x7e7   : > { %2108 = vmatprep.subr.bf16.mxu1 %v2347_v10 }
 0x7e8   : > { %p2281_p9 = pnand %p2280_p7, %p2274_p8 }
 0x8b4   : > { %v1276_v27 = vpop.f32.mrb[6].mxu1 }
 0x8b5   : > { %v2045_v28 = vpop.f32.mrb[7].mxu1  ;;  %2049 = vmatmul.mubr.msk.f32.vlgmr.msra.gmra.mrb[10].mxu0 %vm642_vm2, %v1276_v27 }
 0x8b6   : > { %2058 = vmatprep.mubr.msk.f32.mxu0 %vm2348_vm1, %v2349_v13 }
 0x8b8   : > { %v1428_v29 = vpop.f32.mrb[8].mxu1 }
 0x8b9   : > { %v1429_v30 = vadd.f32 %v2638_v31, %v1428_v29  ;;  %v2055_v32 = vpop.f32.mrb[9].mxu1  ;;  %v1947_v29 = vld [vmem:[%s2853_s27] ss:$0 sm:$0xff] }
 0x8bb   : > { %v1432_v33 = vsel %vm642_vm2, %v1429_v30, -inf }
 0x8bc   : > { %1433 = vmax.xlane.f32.xlu1 %v1432_v33 }
 0x949   : > { %v1434_v34 = vpop.xlane.xlu1 %1433 }
 0x94a   : > { %v1435_v35 = vsub.f32 %v1429_v30, %v1434_v34 }
 0x94c   : > { %v1436_v36 = vmul.f32 1.442695, %v1435_v35 }
 0x94e   : > { %2207 = vpow2.f32 %v1436_v36 }
 0x958   : > { %v2208_v37 = vpop.eup %2207 }
 0x959   : > { %v1438_v38 = vsel %vm642_vm2, %v2208_v37, 0.0 }
 0x95a   : > { %1439 = vadd.xlane.f32.xlu0 %v1438_v38 }
 0x970   : > { %1443 = vrot.lane.b32.xlu0 %v2620_v26, %s2360_s14  ;;  %s2766_s14 = scalar_lea.hbm %s2854_s25, %s1949_s29 }
 0x988   : > { %v1349_v31 = vpop.f32.mrb[10].mxu0 }
 0x989   : > { %v1353_v40 = vadd.f32 %v1349_v31, %v1112_v6  ;;  %v2050_v41 = vpop.f32.mrb[11].mxu0  ;;  %v1720_v6 = vld [vmem:[%s2822_s12 + $0x20] sm:$0xff] }
 0x98a   : > { %v2115_v8 = vpack.c.bf16 %v1721_v7, %v1720_v6 }
 0x9e7   : > { %v1440_v42 = vpop.xlane.xlu0 %1439 }
 0x9e8   : > { %2209 = vrcp.f32 %v1440_v42 }
 0x9eb   : > { %v1444_v43 = vpop.permute.xlu0 %1443 }
 0x9ec   : > { %2057 = vmatpush3.msra.mxu0 %v1444_v43 }
 0x9ed   : > { %2102 = vmatprep.subr.bf16.mxu0 %v2347_v10 }
 0x9f2   : > { %v2210_v44 = vpop.eup %2209 }
 0x9f3   : > { %v1442_v45 = vmul.f32 %v2210_v44, %v2208_v37 }
 0x9f5   : > { %2059 = vmatmul.mubr.msk.f32.vlgmr.msra.gmra.mrb[12].mxu0 %vm642_vm2, %v1442_v45 }
 0x9f6   : > { %2074 = vmatprep.mubr.msk.f32.mxu0 %vm2348_vm1, %v2349_v13 }
 0xac8   : > { %v1515_v26 = vpop.f32.mrb[12].mxu0 }
 0xac9   : > { %v2060_v46 = vpop.f32.mrb[13].mxu0  ;;  %2064 = vmatmul.mubr.msk.f32.vlgmr.msra.gmra.mrb[10].mxu1 %vm642_vm2, %v1515_v26 }
 0xaca   : > { %2093 = vmatprep.mubr.msk.f32.mxu1 %vm2348_vm1, %v2349_v13  ;;  %v1631_v13 = vld [vmem:[#allocation5] sm:$0xff]  ;;  %2110 = vmatpush3.bf16.msra.mxu1 %v2109_v3 }
 0xacb   : > { %v2103_v60 = vpack.c.bf16 %v1632_v59, %v1631_v13  ;;  %2111 = vmatprep.subr.bf16.mxu1 %v2347_v10 }
 0xacd   : > { %2104 = vmatpush3.bf16.msra.mxu0 %v2103_v60 }
 0xace   : > { %2105 = vmatprep.subr.bf16.mxu0 %v2347_v10  ;;  %2113 = vmatpush3.bf16.msra.mxu1 %v2112_v5 }
 0xacf   : > { %2114 = vmatprep.subr.bf16.mxu1 %v2347_v10 }
 0xad2   : > { %2116 = vmatpush3.bf16.msra.mxu1 %v2115_v8 }
 0xad3   : > { %2117 = vmatprep.subr.bf16.mxu1 %v2347_v10  ;;  %v1722_v10 = vld [vmem:[%s2822_s12 + $0x30] sm:$0xff] }
 0xad4   : > { %v2118_v21 = vpack.c.bf16 %v1723_v20, %v1722_v10 }
 0xad6   : > { %2119 = vmatpush3.bf16.msra.mxu1 %v2118_v21 }
 0xb9c   : > { %v1588_v47 = vpop.f32.mrb[10].mxu1 }
 0xb9d   : > { %v1592_v48 = vadd.f32 %v1588_v47, %v1353_v40  ;;  %v2065_v49 = vpop.f32.mrb[11].mxu1 }
 0xb9f   : > { %v1593_v51 = vadd.f32 %v1592_v48, %v2582_v0  ;;  %v2106_v0 = vpack.c.bf16 %v1634_v62, %v1633_v61 }
 0xba1   : > { %v1601_v52 = vadd.f32 %v1941_v50, %v1593_v51  ;;  %2107 = vmatpush3.bf16.msra.mxu0 %v2106_v0 }
 0xba3   : > { %v1604_v53 = vsel %vm516_vm0, %v1601_v52, 0.0 }
 0xba4   : > { %1605 = vadd.xlane.f32.xlu1 %v1604_v53 }
 0xc31   : > { %v1606_v54 = vpop.xlane.xlu1 %1605 }
 0xc32   : > { %v1607_v55 = vmul.f32 0.03125, %v1606_v54 }
 0xc34   : > { %v1608_v56 = vsub.f32 %v1601_v52, %v1607_v55 }
 0xc36   : > { %v1609_v57 = vmul.f32 %v1608_v56, %v1608_v56 }
 0xc38   : > { %v1610_v58 = vsel %vm516_vm0, %v1609_v57, 0.0 }
 0xc39   : > { %1611 = vadd.xlane.f32.xlu1 %v1610_v58 }
 0xcc6   : > { %v1612_v9 = vpop.xlane.xlu1 %1611 }
 0xcc7   : > { %v1613_v11 = vmul.f32 0.03125, %v1612_v9 }
 0xcc9   : > { %v1614_v12 = vadd.f32 1e-06, %v1613_v11 }
 0xccb   : > { %2211 = vrsqrt.f32 %v1614_v12 }
 0xcd5   : > { %v2212_v14 = vpop.eup %2211 }
 0xcd6   : > { %v1616_v16 = vmul.f32 %v2212_v14, %v1608_v56 }
 0xcd8   : > { %v1623_v18 = vmul.f32 %v1942_v15, %v1616_v16 }
 0xcda   : > { %v1630_v19 = vadd.f32 %v1943_v17, %v1623_v18 }
 0xcdc   : > { %2075 = vmatmul.mubr.msk.f32.vlgmr.msra.gmra.mrb[14].mxu0 %vm516_vm0, %v1630_v19 }
 0xdaf   : > { %v1711_v23 = vpop.f32.mrb[14].mxu0 }
 0xdb0   : > { %v1712_v24 = vadd.f32 %v1944_v22, %v1711_v23  ;;  %v2076_v25 = vpop.f32.mrb[15].mxu0 }
 0xdb2   : > { %v1715_v27 = vmax.f32 %v1712_v24, 0.0 }
 0xdb4   : > { %2094 = vmatmul.mubr.msk.f32.vlgmr.msra.gmra.mrb[12].mxu1 %vm1724_vm3, %v1715_v27 }
 0xe87   : > { %v1794_v28 = vpop.f32.mrb[12].mxu1 }
 0xe88   : > { %v1798_v30 = vadd.f32 %v1794_v28, %v1601_v52  ;;  %v2095_v32 = vpop.f32.mrb[13].mxu1 }
 0xe8a   : > { %v1806_v33 = vadd.f32 %v1947_v29, %v1798_v30 }
 0xe8c   : > { %1807 = vst.msk [vmem:[%s507_s19] sm:$0xff] %vm516_vm0, %v1806_v33 }
 0xe8d   : > { %2284 = shalt.err (!%p2281_p9)
}
 0xe8e   : > { %s2285_s13 = scalar_lea.hbm %s2766_s14, 128  ;;  %s2289_s29 = scalar_lea.hbm %s2854_s25, 512 }
 0xe8f   : > { %p2286_p11 = scmp.ne.s32.totalorder %s2766_s14, %s2285_s13  ;;  %p2290_p2 = scmp.lt.u32.totalorder %s2766_s14, %s2854_s25 }
 0xe90   : > { %p2291_p10 = scmp.lt.u32.totalorder %s2289_s29, %s2285_s13  ;;  %p2293_p4 = scmp.lt.u32.totalorder %s2285_s13, %s2766_s14 }
 0xe91   : > { %p2287_p5 = pnand %p2286_p11, %p2520_p12 }
 0xe92   : > { %p2292_p1 = por %p2291_p10, %p2290_p2 }
 0xe93   : > { %p2288_p0 = pneg %p2287_p5 }
 0xe94   : > { %p2294_p6 = por %p2293_p4, %p2292_p1 }
 0xe96   : > { %p2295_p8 = pnand %p2294_p6, %p2288_p0 }
 0xe98   : > { %2298 = shalt.err (!%p2295_p8)
}
 0xe99   : > { %2126 = dma.vmem_to_hbm [thread:$0]  (%p2520_p12), %s2768_s24, 128, %s2766_s14, %s1809_s22  }
 0xe9a PF: > { %s2855_s23 = sld [smem:[#allocation11_spill]]  ;;  %s2856_s20 = sld [smem:[#allocation12_spill]] }
 0xe9b   : > { %p2143_p13 = scmp.ge.s32.totalorder %s2341_s16, 2 }
 0xea0   : > { %s1834_s17 = sand.u32 1, %s2855_s23   ;;  %p2857_p3 = scmp.ne.s32.totalorder %s2856_s20, 0 }
 0xea1   : > { %s1835_s9 = scalar_lea.sflag [#allocation4], %s1834_s17 }
 0xea2   : > { %p2137_p7 = pnand %p2143_p13, %p2857_p3 }
 0xea4   : > { %2324 = dma.done.wait (!%p2137_p7), %s1835_s9, 128  }
 0xea5   : > { %2326 = vsyncadd (!%p2137_p7), %s1835_s9, 4294967168  ;;  %s2858_s16 = sld [smem:[#allocation13_spill]]  ;;  %s2859_s29 = smov %s2333_s30 }
 0xea6   : > { %s2860_s30 = smov %s2337_s15  ;;  %s2861_s15 = smov %s2516_s11 }
 0xeab   : > { %p28_p9 = scmp.ge.s32.totalorder %s2858_s16, 6  }
 0xead   :  { %30 = sbr.rel (!%p28_p9) target bundleno = 11 (0xb), region = 128 }
 0xeb4   :  { %1840 = vsyncpa [#allocation3], 1 }
 0xeb5   :  { %1842 = vsyncpa [#allocation3 + $0x1], 1 }
 0xeb6   :  { %1843 = vsyncpa [#allocation6], 1 }
 0xeb7   :  { %1844 = vsyncpa [#allocation4], 1 }
 0xeb8   :  { %1846 = vsyncpa [#allocation4 + $0x1], 1 }

</bundles_post_ra>
